<compile_context>
chip_gen: v6e
topology: v6e:2x2x1
jax: 0.10.0
libtpu: 0.0.40
codegen_flags: <defaults>
</compile_context>

<pallas_src>
import jax
import jax.numpy as jnp
from jax.experimental import pallas as pl
from jax.experimental.pallas import tpu as pltpu


# --------------------------------------------------------------------------
# Kernels
# --------------------------------------------------------------------------

def _combine_kernel(w_ref, h_ref, hc_ref, acc_ref):
    """One (tm, td) tile of  h_comb = sum_{w_i>0} w_i * H_i.

    w_ref  : SMEM (num_ops,)          f32  (scalar prefetch)
    h_ref  : VMEM (num_ops, tm, td)   f32
    hc_ref : VMEM (tm, td)            compute dtype (output)
    acc_ref: VMEM (tm, td)            f32 scratch
    """
    num_ops = h_ref.shape[0]
    acc_ref[...] = jnp.zeros_like(acc_ref)
    for i in range(num_ops):
        w_i = w_ref[i]

        @pl.when(w_i > 0)
        def _(i=i, w_i=w_i):
            # Inactive ops skip the M x td multiply-add entirely, and their
            # (possibly NaN/Inf) features never touch the accumulator.
            acc_ref[...] += w_i * h_ref[i]

    hc_ref[...] = acc_ref[...].astype(hc_ref.dtype)


def _matmul_kernel(w_ref, mask_ref, hc_ref, out_ref, acc_ref):
    """One (tn, td) output tile of  mask @ h_comb + neg_sum,  K-tiled.

    w_ref   : SMEM (num_ops,)   f32  (scalar prefetch; only used for neg_sum)
    mask_ref: VMEM (tn, tk)     compute dtype
    hc_ref  : VMEM (tk, td)     compute dtype
    out_ref : VMEM (tn, td)     f32
    acc_ref : VMEM (tn, td)     f32 scratch (resident across the K axis)
    """
    k = pl.program_id(2)

    @pl.when(k == 0)
    def _():
        acc_ref[...] = jnp.zeros_like(acc_ref)

    acc_ref[...] += jnp.dot(mask_ref[...], hc_ref[...],
                            preferred_element_type=jnp.float32)

    @pl.when(k == pl.num_programs(2) - 1)
    def _():
        # neg_sum = sum of non-positive weights (tiny unrolled scalar loop).
        neg = jnp.float32(0.0)
        for i in range(w_ref.shape[0]):
            w_i = w_ref[i]
            neg = neg + jnp.where(w_i > 0, jnp.float32(0.0), w_i)
        out_ref[...] = (acc_ref[...] + neg).astype(out_ref.dtype)


# --------------------------------------------------------------------------
# Tiling helpers
# --------------------------------------------------------------------------

def _pick_tile(dim, preferred, quantum):
    """Largest multiple of `quantum` that divides `dim` and is <= `preferred`;
    falls back to the full dim (full-extent blocks are always legal)."""
    t = min(preferred, dim)
    t = (t // quantum) * quantum
    while t >= quantum:
        if dim % t == 0:
            return t
        t -= quantum
    return dim


def _vmem_budget_and_limit():
    """Generation-aware per-step VMEM budget and scoped-VMEM limit."""
    cap = 64 << 20  # conservative fallback (v7x per-TensorCore VMEM)
    try:
        cap = int(getattr(pltpu.get_tpu_info(), "vmem_capacity_bytes", cap))
    except Exception:
        pass
    if cap >= (128 << 20):        # v5e / v6e: 128 MiB physical
        budget = 48 << 20
    else:                          # v7x: 64 MiB per TensorCore
        budget = 24 << 20
    limit = min(int(cap * 0.9), budget + (16 << 20))
    return budget, limit


def _cap(v, c):
    return v if c is None else min(v, c)


# --------------------------------------------------------------------------
# Wrapper
# --------------------------------------------------------------------------

def mixed_op_shared(mask_matrix, h_ops, weights, *,
                    compute_dtype=jnp.float32, tile_caps=None):
    """MixedOpShared forward.

    mask_matrix: (N, M) f32 (torch.spmm's sparse operand, densified)
    h_ops      : (num_ops, M, D) f32 (stacked h_op_list)
    weights    : (num_ops,) f32 architecture weights
    compute_dtype: dtype the MXU matmul runs in. jnp.bfloat16 (opt-in) hits
        the native MXU path and halves mask/h_comb traffic at reduced
        precision; default f32 matches the PyTorch numerics.
    tile_caps  : optional (cap_n, cap_d, cap_k) to force smaller tiles
        (testing / tuning).
    Returns (N, D) f32.
    """
    num_ops, M, D = h_ops.shape
    N = mask_matrix.shape[0]
    isz = jnp.dtype(compute_dtype).itemsize
    budget, vmem_limit = _vmem_budget_and_limit()
    cap_n, cap_d, cap_k = tile_caps if tile_caps is not None else (None,) * 3

    # ---------------- Stage 1: h_comb = sum_{w_i>0} w_i * H_i -------------
    tm = td1 = None
    for pm, pd in ((512, 512), (512, 256), (256, 256), (128, 256),
                   (128, 128), (64, 128), (32, 128), (8, 128)):
        tm = _pick_tile(M, _cap(pm, cap_k), 8)
        td1 = _pick_tile(D, _cap(pd, cap_d), 128)
        b = (2 * num_ops * tm * td1 * 4   # H slab, double-buffered, f32
             + 2 * tm * td1 * isz         # output tile, double-buffered
             + tm * td1 * 4)              # f32 accumulator scratch
        if b <= budget:
            break

    combine_cost = pl.CostEstimate(
        flops=2 * num_ops * M * D,
        transcendentals=0,
        bytes_accessed=4 * num_ops * M * D + isz * M * D,
    )
    h_comb = pl.pallas_call(
        _combine_kernel,
        out_shape=jax.ShapeDtypeStruct((M, D), compute_dtype),
        grid_spec=pltpu.PrefetchScalarGridSpec(
            num_scalar_prefetch=1,                    # weights -> SMEM
            grid=(M // tm, D // td1),
            in_specs=[pl.BlockSpec((num_ops, tm, td1),
                                   lambda m, d, w: (0, m, d))],
            out_specs=pl.BlockSpec((tm, td1), lambda m, d, w: (m, d)),
            scratch_shapes=[pltpu.VMEM((tm, td1), jnp.float32)],
        ),
        compiler_params=pltpu.CompilerParams(
            dimension_semantics=("parallel", "parallel"),
            vmem_limit_bytes=vmem_limit),
        cost_estimate=combine_cost,
    )(weights, h_ops)

    # ---------------- Stage 2: out = mask @ h_comb + neg_sum --------------
    mask_c = mask_matrix.astype(compute_dtype)

    tn = td = tk = None
    for pn, pd, pk in ((256, 512, 1024), (256, 512, 512), (256, 256, 512),
                       (128, 256, 512), (128, 256, 256), (128, 128, 256),
                       (64, 128, 256), (32, 128, 128), (16, 128, 128),
                       (8, 128, 128)):
        tn = _pick_tile(N, _cap(pn, cap_n), 8)
        td = _pick_tile(D, _cap(pd, cap_d), 128)
        tk = _pick_tile(M, _cap(pk, cap_k), 128)
        b = (2 * tn * tk * isz            # mask tile, double-buffered
             + 2 * tk * td * isz          # h_comb tile, double-buffered
             + 2 * tn * td * 4            # output tile, double-buffered
             + tn * td * 4)               # f32 accumulator scratch
        if b <= budget:
            break
    # TODO(synk): for large ragged N/M/D (not divisible by 8/128), pad the
    # operands to MXU-friendly multiples in the wrapper instead of falling
    # back to full-extent blocks.

    gn, gd, gk = N // tn, D // td, M // tk
    matmul_cost = pl.CostEstimate(
        flops=2 * N * M * D,
        transcendentals=0,
        # mask is streamed once per D tile, h_comb once per N tile.
        bytes_accessed=isz * N * M * gd + isz * M * D * gn + 4 * N * D,
    )
    out = pl.pallas_call(
        _matmul_kernel,
        out_shape=jax.ShapeDtypeStruct((N, D), jnp.float32),
        grid_spec=pltpu.PrefetchScalarGridSpec(
            num_scalar_prefetch=1,                    # weights -> SMEM
            grid=(gn, gd, gk),
            in_specs=[
                pl.BlockSpec((tn, tk), lambda i, j, k, w: (i, k)),
                pl.BlockSpec((tk, td), lambda i, j, k, w: (k, j)),
            ],
            out_specs=pl.BlockSpec((tn, td), lambda i, j, k, w: (i, j)),
            scratch_shapes=[pltpu.VMEM((tn, td), jnp.float32)],
        ),
        compiler_params=pltpu.CompilerParams(
            # Output tiles are independent -> megacore sharding; K (the
            # contraction) is the sequential accumulator axis.
            dimension_semantics=("parallel", "parallel", "arbitrary"),
            vmem_limit_bytes=vmem_limit),
        cost_estimate=matmul_cost,
    )(weights, mask_c, h_comb)
    return out


# --------------------------------------------------------------------------
# Pure-JAX reference (mirrors the PyTorch loop)
# --------------------------------------------------------------------------

def mixed_op_shared_ref(mask_matrix, h_ops, weights):
    out = jnp.zeros((mask_matrix.shape[0], h_ops.shape[-1]), jnp.float32)
    for i in range(h_ops.shape[0]):
        w = weights[i]
        out = out + jnp.where(w > 0, w * (mask_matrix @ h_ops[i]), w)
    return out


# --------------------------------------------------------------------------
# Demo / self-test
# --------------------------------------------------------------------------

if __name__ == "__main__":
    key = jax.random.PRNGKey(0)
    k_mask, k_sp, k_h, k_w, k_mask2, k_sp2, k_h2, k_w2 = jax.random.split(key, 8)

    num_ops = 4

    # --- case 1: tiny shapes, f32, single-tile grid -----------------------
    N, M, D = 16, 16, 128
    mask = jax.random.normal(k_mask, (N, M), jnp.float32)
    mask = mask * (jax.random.uniform(k_sp, (N, M)) > 0.5).astype(jnp.float32)
    h_ops = jax.random.normal(k_h, (num_ops, M, D), jnp.float32)
    weights = jax.random.uniform(k_w, (num_ops,), jnp.float32,
                                 minval=-0.5, maxval=0.5)

    out = jax.block_until_ready(mixed_op_shared(mask, h_ops, weights))
    ref = mixed_op_shared_ref(mask, h_ops, weights)
    assert out.shape == (N, D)
    assert jnp.allclose(out, ref, atol=1e-4, rtol=1e-4), (
        f"max abs err {float(jnp.max(jnp.abs(out - ref)))}")

    # --- case 2: small shapes, forced multi-tile grid (N, D, K), f32 ------
    N2, M2, D2 = 32, 256, 256
    mask2 = jax.random.normal(k_mask2, (N2, M2), jnp.float32)
    mask2 = mask2 * (jax.random.uniform(k_sp2, (N2, M2)) > 0.5).astype(jnp.float32)
    h2 = jax.random.normal(k_h2, (num_ops, M2, D2), jnp.float32)
    w2 = jax.random.uniform(k_w2, (num_ops,), jnp.float32,
                            minval=-0.5, maxval=0.5)

    out2 = jax.block_until_ready(
        mixed_op_shared(mask2, h2, w2, tile_caps=(16, 128, 128)))
    ref2 = mixed_op_shared_ref(mask2, h2, w2)
    assert jnp.allclose(out2, ref2, atol=1e-3, rtol=1e-3), (
        f"max abs err {float(jnp.max(jnp.abs(out2 - ref2)))}")

    # --- case 3: opt-in bf16 MXU path (same inputs), loose tolerance ------
    out3 = jax.block_until_ready(
        mixed_op_shared(mask2, h2, w2, compute_dtype=jnp.bfloat16))
    rel = float(jnp.max(jnp.abs(out3 - ref2)) /
                (jnp.max(jnp.abs(ref2)) + 1e-6))
    assert rel < 0.05, f"bf16 relative err {rel}"

    print("KERNEL_OK")
</pallas_src>

<mosaic_0001>
module attributes {stable_mosaic.version = 11 : i64} {
  func.func @_combine_kernel(%arg0: i32, %arg1: i32, %arg2: memref<4xf32, #tpu.memory_space<smem>>, %arg3: memref<4x16x128xf32, #tpu.memory_space<vmem>>, %arg4: memref<16x128xf32, #tpu.memory_space<vmem>>, %arg5: memref<16x128xf32, #tpu.memory_space<vmem>>) attributes {dimension_semantics = [#tpu.dimension_semantics<parallel>, #tpu.dimension_semantics<parallel>], iteration_bounds = array<i64: 1, 1>, scalar_prefetch = 1 : i64, scratch_operands = 1 : i64, tpu.core_type = #tpu.core_type<tc>, window_params = [{transform_indices = @transform_0, window_bounds = array<i64: 4, 16, 128>}, {transform_indices = @transform_1, window_bounds = array<i64: 16, 128>}]} {
    %cst = arith.constant 0.000000e+00 : f32
    %0 = vector.broadcast %cst : f32 to vector<16x128xf32>
    %c0 = arith.constant 0 : index
    %c0_0 = arith.constant 0 : index
    %1 = vector.load %arg5[%c0, %c0_0] : memref<16x128xf32, #tpu.memory_space<vmem>>, vector<16x128xf32>
    tpu.vector_store %arg5[%c0, %c0_0], %0 {strides = array<i32>} : memref<16x128xf32, #tpu.memory_space<vmem>>, vector<16x128xf32>,
    %c0_1 = arith.constant 0 : index
    %2 = memref.load %arg2[%c0_1] : memref<4xf32, #tpu.memory_space<smem>>
    %cst_2 = arith.constant 0.000000e+00 : f32
    %3 = arith.cmpf ogt, %2, %cst_2 : f32
    %4 = arith.extui %3 : i1 to i32
    %c0_i32 = arith.constant 0 : i32
    %5 = arith.cmpi ne, %4, %c0_i32 : i32
    scf.if %5 {
      %c0_13 = arith.constant 0 : index
      %c0_14 = arith.constant 0 : index
      %20 = vector.load %arg5[%c0_13, %c0_14] : memref<16x128xf32, #tpu.memory_space<vmem>>, vector<16x128xf32>
      %c0_15 = arith.constant 0 : index
      %c0_16 = arith.constant 0 : index
      %c0_17 = arith.constant 0 : index
      %21 = vector.load %arg3[%c0_15, %c0_16, %c0_17] : memref<4x16x128xf32, #tpu.memory_space<vmem>>, vector<1x16x128xf32>
      %22 = vector.shape_cast %21 : vector<1x16x128xf32> to vector<16x128xf32>
      %23 = vector.broadcast %2 : f32 to vector<16x128xf32>
      %24 = arith.mulf %23, %22 : vector<16x128xf32>
      %25 = arith.addf %20, %24 : vector<16x128xf32>
      %c0_18 = arith.constant 0 : index
      %c0_19 = arith.constant 0 : index
      %26 = vector.load %arg5[%c0_18, %c0_19] : memref<16x128xf32, #tpu.memory_space<vmem>>, vector<16x128xf32>
      tpu.vector_store %arg5[%c0_18, %c0_19], %25 {strides = array<i32>} : memref<16x128xf32, #tpu.memory_space<vmem>>, vector<16x128xf32>,
    } else {
    }
    %c1 = arith.constant 1 : index
    %6 = memref.load %arg2[%c1] : memref<4xf32, #tpu.memory_space<smem>>
    %cst_3 = arith.constant 0.000000e+00 : f32
    %7 = arith.cmpf ogt, %6, %cst_3 : f32
    %8 = arith.extui %7 : i1 to i32
    %c0_i32_4 = arith.constant 0 : i32
    %9 = arith.cmpi ne, %8, %c0_i32_4 : i32
    scf.if %9 {
      %c0_13 = arith.constant 0 : index
      %c0_14 = arith.constant 0 : index
      %20 = vector.load %arg5[%c0_13, %c0_14] : memref<16x128xf32, #tpu.memory_space<vmem>>, vector<16x128xf32>
      %c1_15 = arith.constant 1 : index
      %c0_16 = arith.constant 0 : index
      %c0_17 = arith.constant 0 : index
      %21 = vector.load %arg3[%c1_15, %c0_16, %c0_17] : memref<4x16x128xf32, #tpu.memory_space<vmem>>, vector<1x16x128xf32>
      %22 = vector.shape_cast %21 : vector<1x16x128xf32> to vector<16x128xf32>
      %23 = vector.broadcast %6 : f32 to vector<16x128xf32>
      %24 = arith.mulf %23, %22 : vector<16x128xf32>
      %25 = arith.addf %20, %24 : vector<16x128xf32>
      %c0_18 = arith.constant 0 : index
      %c0_19 = arith.constant 0 : index
      %26 = vector.load %arg5[%c0_18, %c0_19] : memref<16x128xf32, #tpu.memory_space<vmem>>, vector<16x128xf32>
      tpu.vector_store %arg5[%c0_18, %c0_19], %25 {strides = array<i32>} : memref<16x128xf32, #tpu.memory_space<vmem>>, vector<16x128xf32>,
    } else {
    }
    %c2 = arith.constant 2 : index
    %10 = memref.load %arg2[%c2] : memref<4xf32, #tpu.memory_space<smem>>
    %cst_5 = arith.constant 0.000000e+00 : f32
    %11 = arith.cmpf ogt, %10, %cst_5 : f32
    %12 = arith.extui %11 : i1 to i32
    %c0_i32_6 = arith.constant 0 : i32
    %13 = arith.cmpi ne, %12, %c0_i32_6 : i32
    scf.if %13 {
      %c0_13 = arith.constant 0 : index
      %c0_14 = arith.constant 0 : index
      %20 = vector.load %arg5[%c0_13, %c0_14] : memref<16x128xf32, #tpu.memory_space<vmem>>, vector<16x128xf32>
      %c2_15 = arith.constant 2 : index
      %c0_16 = arith.constant 0 : index
      %c0_17 = arith.constant 0 : index
      %21 = vector.load %arg3[%c2_15, %c0_16, %c0_17] : memref<4x16x128xf32, #tpu.memory_space<vmem>>, vector<1x16x128xf32>
      %22 = vector.shape_cast %21 : vector<1x16x128xf32> to vector<16x128xf32>
      %23 = vector.broadcast %10 : f32 to vector<16x128xf32>
      %24 = arith.mulf %23, %22 : vector<16x128xf32>
      %25 = arith.addf %20, %24 : vector<16x128xf32>
      %c0_18 = arith.constant 0 : index
      %c0_19 = arith.constant 0 : index
      %26 = vector.load %arg5[%c0_18, %c0_19] : memref<16x128xf32, #tpu.memory_space<vmem>>, vector<16x128xf32>
      tpu.vector_store %arg5[%c0_18, %c0_19], %25 {strides = array<i32>} : memref<16x128xf32, #tpu.memory_space<vmem>>, vector<16x128xf32>,
    } else {
    }
    %c3 = arith.constant 3 : index
    %14 = memref.load %arg2[%c3] : memref<4xf32, #tpu.memory_space<smem>>
    %cst_7 = arith.constant 0.000000e+00 : f32
    %15 = arith.cmpf ogt, %14, %cst_7 : f32
    %16 = arith.extui %15 : i1 to i32
    %c0_i32_8 = arith.constant 0 : i32
    %17 = arith.cmpi ne, %16, %c0_i32_8 : i32
    scf.if %17 {
      %c0_13 = arith.constant 0 : index
      %c0_14 = arith.constant 0 : index
      %20 = vector.load %arg5[%c0_13, %c0_14] : memref<16x128xf32, #tpu.memory_space<vmem>>, vector<16x128xf32>
      %c3_15 = arith.constant 3 : index
      %c0_16 = arith.constant 0 : index
      %c0_17 = arith.constant 0 : index
      %21 = vector.load %arg3[%c3_15, %c0_16, %c0_17] : memref<4x16x128xf32, #tpu.memory_space<vmem>>, vector<1x16x128xf32>
      %22 = vector.shape_cast %21 : vector<1x16x128xf32> to vector<16x128xf32>
      %23 = vector.broadcast %14 : f32 to vector<16x128xf32>
      %24 = arith.mulf %23, %22 : vector<16x128xf32>
      %25 = arith.addf %20, %24 : vector<16x128xf32>
      %c0_18 = arith.constant 0 : index
      %c0_19 = arith.constant 0 : index
      %26 = vector.load %arg5[%c0_18, %c0_19] : memref<16x128xf32, #tpu.memory_space<vmem>>, vector<16x128xf32>
      tpu.vector_store %arg5[%c0_18, %c0_19], %25 {strides = array<i32>} : memref<16x128xf32, #tpu.memory_space<vmem>>, vector<16x128xf32>,
    } else {
    }
    %c0_9 = arith.constant 0 : index
    %c0_10 = arith.constant 0 : index
    %18 = vector.load %arg5[%c0_9, %c0_10] : memref<16x128xf32, #tpu.memory_space<vmem>>, vector<16x128xf32>
    %c0_11 = arith.constant 0 : index
    %c0_12 = arith.constant 0 : index
    %19 = vector.load %arg4[%c0_11, %c0_12] : memref<16x128xf32, #tpu.memory_space<vmem>>, vector<16x128xf32>
    tpu.vector_store %arg4[%c0_11, %c0_12], %18 {strides = array<i32>} : memref<16x128xf32, #tpu.memory_space<vmem>>, vector<16x128xf32>,
    return
  }
  func.func @transform_0(%arg0: i32, %arg1: i32, %arg2: memref<4xf32, #tpu.memory_space<smem>>) -> (i32, i32, i32) {
    %c0_i32 = arith.constant 0 : i32
    %c0_i32_0 = arith.constant 0 : i32
    return %c0_i32, %arg0, %arg1 : i32, i32, i32
  }
  func.func @transform_1(%arg0: i32, %arg1: i32, %arg2: memref<4xf32, #tpu.memory_space<smem>>) -> (i32, i32) {
    %c0_i32 = arith.constant 0 : i32
    return %arg0, %arg1 : i32, i32
  }
}

</mosaic_0001>

<bundles_post_ra>
// kernel: tpu_custom_call.1
= control target key start
LH: loop header
LB: loop body
LE: loop exit
PB: predicated region body
PF: predicated region fallthrough
CT: control target
= control target key end

     0   :  { %s181_s9 = smov [#allocation4]   ;;  %s217_s0 = inlined_call_operand.hbm [shape: f32[4], index: 0, kind: input, shape index: {}]   ;;  %s218_s1 = inlined_call_operand.hbm [shape: f32[4,16,128], index: 1, kind: input, shape index: {}]   ;;  %s219_s2 = inlined_call_operand.hbm [shape: f32[16,128], index: 2, kind: output, shape index: {}]  }
   0x1   :  { %8 = dma.hbm_to_smem %s217_s0, 16, %s181_s9, [#allocation3] }
   0x2   :  { %175 = dma.done.wait [#allocation3], 16 }
   0x3   :  { %176 = vsyncadd [#allocation3], 4294967280 }
   0x4   :  { %10 = sfence }
   0x5   :  { %11 = vsyncpa [#allocation6], 0 }
   0x6   :  { %12 = vsyncpa [#allocation7], 0  ;;  %s182_s12 = smov [#allocation5]  }
   0x7   :  { %s18_s13 = sshll.u32 %s182_s12, 4  ;;  %s19_s13 = int_to_ptr.vmem [resolvable:$true] %s18_s13 }
   0x8   :  { %s143_s14 = scalar_lea.vmem %s19_s13, 1024  ;;  %p148_p1 = scmp.lt.s32.totalorder %s19_s13, %s19_s13 }
   0x9   :  { %p144_p0 = scmp.ne.s32.totalorder %s19_s13, %s143_s14  ;;  %p149_p2 = scmp.lt.s32.totalorder %s143_s14, %s143_s14 }
   0xb   :  { %p150_p3 = por %p149_p2, %p148_p1 }
   0xd   :  { %p151_p4 = pnand %p150_p3, %p144_p0 }
   0xf   :  { %154 = shalt.err (!%p151_p4)
}
  0x10   :  { %s183_s15 = smov 128   ;;  %s184_s16 = smov 8  }
  0x11   :  { %24 = dma.hbm_to_vmem [thread:$0]  %s218_s1, 1024, %s19_s13, [#allocation6], %s183_s15, %s183_s15, %s184_s16  }
  0x12   :  { %177 = dma.done.wait [#allocation6], 1024  }
  0x13   :  { %178 = vsyncadd [#allocation6], 4294966272  ;;  %s30_s18 = sld [smem:[#allocation4]]  ;;  %v185_v0 = vmov 0.0  }
  0x14   :  { %28 = vst [vmem:[#allocation2] sm:$0xff] %v185_v0  ;;  %29 = vst [vmem:[#allocation2 + $0x8] sm:$0xff] %v185_v0 }
  0x19   :  { %p31_p5 = scmp.gt.f32.partialorder %s30_s18, 0.0 }
  0x1a   :  { %v37_v2 = vld [vmem:[#allocation5] sm:$0xff] (%p31_p5)  ;;  %v39_v3 = vstv (%p31_p5), %s30_s18  ;;  %v38_v6 = vld [vmem:[#allocation5 + $0x8] sm:$0xff] (%p31_p5) }
  0x1b   :  { %34 = sbr.rel (!%p31_p5) target bundleno = 32 (0x20), region = 13  ;;  %v35_v1 = vld [vmem:[#allocation2] sm:$0xff] (%p31_p5)  ;;  %v40_v4 = vmul.f32 (%p31_p5), %v39_v3, %v37_v2  ;;  %v36_v5 = vld [vmem:[#allocation2 + $0x8] sm:$0xff] (%p31_p5)  ;;  %v41_v7 = vmul.f32 (%p31_p5), %v39_v3, %v38_v6 }
  0x1d   :  { %v42_v8 = vadd.f32 (%p31_p5), %v40_v4, %v35_v1  ;;  %v43_v9 = vadd.f32 (%p31_p5), %v41_v7, %v36_v5 }
  0x1f   :  { %44 = vst [vmem:[#allocation2] sm:$0xff] (%p31_p5), %v42_v8  ;;  %45 = vst [vmem:[#allocation2 + $0x8] sm:$0xff] (%p31_p5), %v43_v9 }
  0x20 PF:  { %s118_s1 = sld [smem:[#allocation4 + $0x1]] }
  0x26   :  { %p47_p6 = scmp.gt.f32.partialorder %s118_s1, 0.0 }
  0x27   :  { %v51_v10 = vld [vmem:[#allocation2] sm:$0xff] (%p47_p6)  ;;  %v56_v12 = vstv (%p47_p6), %s118_s1  ;;  %v52_v14 = vld [vmem:[#allocation2 + $0x8] sm:$0xff] (%p47_p6) }
  0x28   :  { %50 = sbr.rel (!%p47_p6) target bundleno = 46 (0x2e), region = 17  ;;  %v54_v11 = vld [vmem:[#allocation5 + $0x10] sm:$0xff] (%p47_p6)  ;;  %v55_v15 = vld [vmem:[#allocation5 + $0x18] sm:$0xff] (%p47_p6) }
  0x29   :  { %v57_v13 = vmul.f32 (%p47_p6), %v56_v12, %v54_v11  ;;  %v58_v16 = vmul.f32 (%p47_p6), %v56_v12, %v55_v15 }
  0x2b   :  { %v59_v17 = vadd.f32 (%p47_p6), %v57_v13, %v51_v10  ;;  %v60_v18 = vadd.f32 (%p47_p6), %v58_v16, %v52_v14 }
  0x2d   :  { %61 = vst [vmem:[#allocation2] sm:$0xff] %v59_v17  ;;  %62 = vst [vmem:[#allocation2 + $0x8] sm:$0xff] %v60_v18 }
  0x2e PF:  { %s119_s19 = sld [smem:[#allocation4 + $0x2]] }
  0x34   :  { %p64_p7 = scmp.gt.f32.partialorder %s119_s19, 0.0 }
  0x35   :  { %v68_v19 = vld [vmem:[#allocation2] sm:$0xff] (%p64_p7)  ;;  %v71_v20 = vld [vmem:[#allocation5 + $0x20] sm:$0xff] (%p64_p7)  ;;  %v73_v21 = vstv (%p64_p7), %s119_s19  ;;  %v69_v23 = vld [vmem:[#allocation2 + $0x8] sm:$0xff] (%p64_p7) }
  0x36   :  { %67 = sbr.rel (!%p64_p7) target bundleno = 60 (0x3c), region = 21  ;;  %v74_v22 = vmul.f32 (%p64_p7), %v73_v21, %v71_v20  ;;  %v72_v24 = vld [vmem:[#allocation5 + $0x28] sm:$0xff] (%p64_p7) }
  0x37   :  { %v75_v25 = vmul.f32 (%p64_p7), %v73_v21, %v72_v24 }
  0x38   :  { %v76_v26 = vadd.f32 (%p64_p7), %v74_v22, %v68_v19 }
  0x39   :  { %v77_v27 = vadd.f32 (%p64_p7), %v75_v25, %v69_v23 }
  0x3a   :  { %78 = vst [vmem:[#allocation2] sm:$0xff] (%p64_p7), %v76_v26 }
  0x3b   :  { %79 = vst [vmem:[#allocation2 + $0x8] sm:$0xff] %v77_v27 }
  0x3c PF:  { %s120_s20 = sld [smem:[#allocation4 + $0x3]] }
  0x42   :  { %p81_p8 = scmp.gt.f32.partialorder %s120_s20, 0.0 }
  0x43   :  { %v85_v28 = vld [vmem:[#allocation2] sm:$0xff] (%p81_p8)  ;;  %v90_v30 = vstv (%p81_p8), %s120_s20  ;;  %v86_v32 = vld [vmem:[#allocation2 + $0x8] sm:$0xff] (%p81_p8) }
  0x44   :  { %84 = sbr.rel (!%p81_p8) target bundleno = 74 (0x4a), region = 25  ;;  %v88_v29 = vld [vmem:[#allocation5 + $0x30] sm:$0xff] (%p81_p8)  ;;  %v89_v33 = vld [vmem:[#allocation5 + $0x38] sm:$0xff] (%p81_p8) }
  0x45   :  { %v91_v31 = vmul.f32 (%p81_p8), %v90_v30, %v88_v29  ;;  %v92_v34 = vmul.f32 (%p81_p8), %v90_v30, %v89_v33 }
  0x47   :  { %v93_v35 = vadd.f32 (%p81_p8), %v91_v31, %v85_v28  ;;  %v94_v36 = vadd.f32 (%p81_p8), %v92_v34, %v86_v32 }
  0x49   :  { %95 = vst [vmem:[#allocation2] sm:$0xff] %v93_v35  ;;  %96 = vst [vmem:[#allocation2 + $0x8] sm:$0xff] %v94_v36 }
  0x4a PF:  { %s186_s21 = smov [#allocation8]  }
  0x4b   :  { %s106_s22 = sshll.u32 %s186_s21, 4  ;;  %s107_s22 = int_to_ptr.vmem [resolvable:$true] %s106_s22 }
  0x4c   :  { %s155_s23 = scalar_lea.vmem %s107_s22, 256  ;;  %p160_p10 = scmp.lt.s32.totalorder %s107_s22, %s107_s22 }
  0x4d   :  { %p156_p9 = scmp.ne.s32.totalorder %s107_s22, %s155_s23  ;;  %p161_p11 = scmp.lt.s32.totalorder %s155_s23, %s155_s23 }
  0x4f   :  { %p162_p12 = por %p161_p11, %p160_p10 }
  0x50   :  { %v97_v37 = vld [vmem:[#allocation2] sm:$0xff]  ;;  %v98_v38 = vld [vmem:[#allocation2 + $0x8] sm:$0xff] }
  0x51   :  { %99 = vst [vmem:[#allocation8] sm:$0xff] %v97_v37  ;;  %100 = vst [vmem:[#allocation8 + $0x8] sm:$0xff] %v98_v38  ;;  %p163_p13 = pnand %p162_p12, %p156_p9 }
  0x53   :  { %166 = shalt.err (!%p163_p13)
}
  0x54   :  { %112 = dma.vmem_to_hbm [thread:$0]  %s107_s22, 256, %s219_s2, [#allocation7], %s183_s15, %s183_s15, %s184_s16  }
  0x55   :  { %179 = dma.done.wait [#allocation7], 256  }
  0x56   :  { %180 = vsyncadd [#allocation7], 4294967040 }
  0x57   :  { %116 = vsyncpa [#allocation6], 1 }
  0x58   :  { %117 = vsyncpa [#allocation7], 1 }

</bundles_post_ra>
